<compile_context>
chip_gen: v7x
topology: tpu7x:2x2x1
jax: 0.10.0
libtpu: 0.0.40
codegen_flags: <defaults>
</compile_context>

<pallas_src>
import math

import jax
import jax.numpy as jnp
from jax.experimental import pallas as pl
from jax.experimental.pallas import tpu as pltpu

EPS = 1e-6


def gem_freq_kernel(p_ref, x_ref, o_ref):
    # p_ref: SMEM scalar parameter, shape (1,)
    # x_ref: VMEM block, shape (1, TC, H, W)
    # o_ref: VMEM block, shape (1, TC, W)   (lane/sublane-dense output)
    p = p_ref[0]
    inv_p = 1.0 / p
    h = x_ref.shape[2]
    log_h = math.log(h)                       # static: folds the 1/H mean scale

    x = x_ref[...]
    xc = jnp.maximum(x, EPS)                  # clamp(min=eps) -> strictly positive
    xp = jnp.exp(p * jnp.log(xc))             # x ** p with traced exponent (EUP)
    s = jnp.sum(xp, axis=2)                   # (1, TC, W) sum over H (sublane axis)
    # (s / H) ** (1/p) == exp(inv_p * (log(s) - log(H))); s > 0 since xp > 0
    o_ref[...] = jnp.exp(inv_p * (jnp.log(s) - log_h)).astype(o_ref.dtype)


def _pick_channel_tile(C, H, W, itemsize, target_bytes=2 << 20):
    """Channel tile so one input block is ~target_bytes (keeps VMEM in budget)."""
    per_c = max(1, H * W * itemsize)
    tc = max(1, target_bytes // per_c)
    if tc >= C:
        return C
    # round down to a multiple of 8 so the output block's sublane dim is dense
    return int(min(max(8, (tc // 8) * 8), C))


def gem_freq_pallas(x, p_param):
    """x: (N, C, H, W) float32, p_param: (1,) float32 -> (N, C, 1, W) float32."""
    N, C, H, W = x.shape
    tc = _pick_channel_tile(C, H, W, x.dtype.itemsize)
    grid = (N, pl.cdiv(C, tc))

    elems = N * C * H * W
    cost = pl.CostEstimate(
        flops=3 * elems,
        transcendentals=2 * elems + 2 * N * C * W,
        bytes_accessed=x.dtype.itemsize * (elems + N * C * W),
    )

    out = pl.pallas_call(
        gem_freq_kernel,
        out_shape=jax.ShapeDtypeStruct((N, C, W), x.dtype),
        grid=grid,
        in_specs=[
            pl.BlockSpec(memory_space=pltpu.MemorySpace.SMEM),        # p (scalar)
            pl.BlockSpec((1, tc, H, W), lambda n, c: (n, c, 0, 0)),   # x
        ],
        out_specs=pl.BlockSpec((1, tc, W), lambda n, c: (n, c, 0)),
        compiler_params=pltpu.CompilerParams(
            dimension_semantics=("parallel", "parallel")),
        cost_estimate=cost,
    )(p_param, x)
    # TODO(synk): forward-only; a custom_vjp would be needed for grads w.r.t. p/x.
    return out.reshape(N, C, 1, W)


def gem_freq_ref(x, p_param):
    p = p_param[0]
    xc = jnp.maximum(x, EPS)
    xp = xc ** p
    m = jnp.mean(xp, axis=-2, keepdims=True)
    return m ** (1.0 / p)


if __name__ == "__main__":
    key = jax.random.PRNGKey(0)
    N, C, H, W = 2, 4, 16, 16
    x = jax.random.uniform(key, (N, C, H, W), dtype=jnp.float32)

    # Deterministic parameter init, matching nn.Parameter(torch.ones(1) * 3)
    p_param = jnp.ones((1,), dtype=jnp.float32) * 3.0

    out = gem_freq_pallas(x, p_param)
    out = jax.block_until_ready(out)

    ref = gem_freq_ref(x, p_param)
    assert out.shape == (N, C, 1, W), out.shape
    assert jnp.allclose(out, ref, atol=1e-5, rtol=1e-5), (
        float(jnp.max(jnp.abs(out - ref))))

    print("KERNEL_OK")
</pallas_src>

<mosaic_0001>
module attributes {stable_mosaic.version = 11 : i64} {
  func.func @gem_freq_kernel(%arg0: i32, %arg1: i32, %arg2: memref<1xf32, #tpu.memory_space<smem>>, %arg3: memref<1x4x16x16xf32, #tpu.memory_space<vmem>>, %arg4: memref<1x4x16xf32, #tpu.memory_space<vmem>>) attributes {dimension_semantics = [#tpu.dimension_semantics<parallel>, #tpu.dimension_semantics<parallel>], iteration_bounds = array<i64: 2, 1>, scalar_prefetch = 0 : i64, scratch_operands = 0 : i64, tpu.core_type = #tpu.core_type<tc>, window_params = [{transform_indices = @transform_0, window_bounds = array<i64: 1>}, {transform_indices = @transform_1, window_bounds = array<i64: 1, 4, 16, 16>}, {transform_indices = @transform_2, window_bounds = array<i64: 1, 4, 16>}]} {
    %c0 = arith.constant 0 : index
    %0 = memref.load %arg2[%c0] : memref<1xf32, #tpu.memory_space<smem>>
    %cst = arith.constant 1.000000e+00 : f32
    %1 = arith.divf %cst, %0 : f32
    %c0_0 = arith.constant 0 : index
    %c0_1 = arith.constant 0 : index
    %c0_2 = arith.constant 0 : index
    %c0_3 = arith.constant 0 : index
    %2 = vector.load %arg3[%c0_0, %c0_1, %c0_2, %c0_3] : memref<1x4x16x16xf32, #tpu.memory_space<vmem>>, vector<1x4x16x16xf32>
    %cst_4 = arith.constant 9.99999997E-7 : f32
    %3 = vector.broadcast %cst_4 : f32 to vector<1x4x16x16xf32>
    %4 = arith.maximumf %2, %3 : vector<1x4x16x16xf32>
    %5 = math.log %4 : vector<1x4x16x16xf32>
    %6 = vector.broadcast %0 : f32 to vector<1x4x16x16xf32>
    %7 = arith.mulf %6, %5 : vector<1x4x16x16xf32>
    %8 = math.exp %7 : vector<1x4x16x16xf32>
    %cst_5 = arith.constant dense<0.000000e+00> : vector<1x4x16xf32>
    %9 = vector.multi_reduction <add>, %8, %cst_5 [2] : vector<1x4x16x16xf32> to vector<1x4x16xf32>
    %10 = math.log %9 : vector<1x4x16xf32>
    %cst_6 = arith.constant 2.77258873 : f32
    %11 = vector.broadcast %cst_6 : f32 to vector<1x4x16xf32>
    %12 = arith.subf %10, %11 : vector<1x4x16xf32>
    %13 = vector.broadcast %1 : f32 to vector<1x4x16xf32>
    %14 = arith.mulf %13, %12 : vector<1x4x16xf32>
    %15 = math.exp %14 : vector<1x4x16xf32>
    %c0_7 = arith.constant 0 : index
    %c0_8 = arith.constant 0 : index
    %c0_9 = arith.constant 0 : index
    %16 = vector.load %arg4[%c0_7, %c0_8, %c0_9] : memref<1x4x16xf32, #tpu.memory_space<vmem>>, vector<1x4x16xf32>
    tpu.vector_store %arg4[%c0_7, %c0_8, %c0_9], %15 {strides = array<i32>} : memref<1x4x16xf32, #tpu.memory_space<vmem>>, vector<1x4x16xf32>,
    return
  }
  func.func @transform_0(%arg0: i32, %arg1: i32) -> i32 {
    %c0_i32 = arith.constant 0 : i32
    %c0_i32_0 = arith.constant 0 : i32
    return %c0_i32 : i32
  }
  func.func @transform_1(%arg0: i32, %arg1: i32) -> (i32, i32, i32, i32) {
    %c0_i32 = arith.constant 0 : i32
    %c0_i32_0 = arith.constant 0 : i32
    %c0_i32_1 = arith.constant 0 : i32
    return %arg0, %arg1, %c0_i32, %c0_i32_0 : i32, i32, i32, i32
  }
  func.func @transform_2(%arg0: i32, %arg1: i32) -> (i32, i32, i32) {
    %c0_i32 = arith.constant 0 : i32
    %c0_i32_0 = arith.constant 0 : i32
    return %arg0, %arg1, %c0_i32 : i32, i32, i32
  }
}

</mosaic_0001>

<bundles_post_ra>
// kernel: tpu_custom_call.1
= control target key start
LH: loop header
LB: loop body
LE: loop exit
PB: predicated region body
PF: predicated region fallthrough
CT: control target
= control target key end

     0   :  { %s869_s0 = inlined_call_operand.<no memory space> [shape: f32[1], index: 0, kind: input, shape index: {}]   ;;  %s870_s1 = inlined_call_operand.hbm [shape: f32[2,4,16,16], index: 1, kind: input, shape index: {}]   ;;  %s871_s2 = inlined_call_operand.hbm [shape: f32[2,4,16], index: 2, kind: output, shape index: {}]  }
   0x1   :  { %7 = sst [smem:[#allocation2]] %s869_s0 }
   0x2   :  { %8 = vsyncpa [#allocation4], 0 }
   0x3   :  { %10 = vsyncpa [#allocation4 + $0x1], 0 }
   0x4   :  { %11 = vsyncpa [#allocation5], 0 }
   0x5   :  { %13 = vsyncpa [#allocation5 + $0x1], 0  ;;  %s687_s11 = smov 0   ;;  %s689_s12 = smov 0  }
   0x6   :  { %s691_s13 = smov 0   ;;  %s693_s14 = smov 0  }
   0x7   :  { %s695_s15 = smov 0   ;;  %s697_s16 = smov 0  }
   0x8 LB: > { %s416_s0 = sadd.s32 4294967295, %s663_s16   ;;  %s417_s17 = sadd.s32 4294967294, %s663_s16   ;;  %s663_s16 = sphi %s697_s16, %s19_s16   ;;  %s659_s15 = sphi %s695_s15, %s886_s15   ;;  %s655_s14 = sphi %s693_s14, %s885_s14   ;;  %s651_s13 = sphi %s691_s13, %s884_s13   ;;  %s647_s12 = sphi %s689_s12, %s883_s12   ;;  %s643_s11 = sphi %s687_s11, %s882_s11  }
   0x9   : > { %s31_s18 = sadd.s32 1, %s659_s15  ;;  %s61_s19 = sadd.s32 1, %s651_s13 }
   0xa   : > { %p33_p0 = scmp.ge.s32.totalorder %s31_s18, 2  ;;  %p68_p1 = scmp.ne.s32.totalorder %s651_s13, %s647_s12 }
   0xb   : > { %p69_p2 = scmp.eq.s32.totalorder %s663_s16, 0  ;;  %p74_p3 = scmp.ne.s32.totalorder %s647_s12, %s643_s11 }
   0xc   : > { %s888_s18 = smov (%p33_p0, %s31_s18), 0  ;;  %p75_p5 = scmp.eq.s32.totalorder %s416_s0, 0 }
   0xd   : > { %p728_p4 = por %p69_p2, %p68_p1  ;;  %s56_s21 = ssub.s32 %s659_s15, %s888_s18 }
   0xe   : > { %p100_p6 = scmp.eq.s32.totalorder %s416_s0, 1  ;;  %p59_p7 = scmp.eq.s32.totalorder %s56_s21, 0 }
   0xf   : > { %p734_p8 = por %p75_p5, %p74_p3  ;;  %p106_p10 = scmp.eq.s32.totalorder %s417_s17, 1 }
  0x10   : > { %p738_p9 = por %p100_p6, %p68_p1  ;;  %p449_p13 = scmp.lt.s32.totalorder %s663_s16, 2 }
  0x11   : > { %s743_s24 = scalar_select %p59_p7, %s651_s13, %s61_s19  }
  0x12   : > { %s875_s23 = scalar_select %p738_p9, 1, 0 }
  0x13   : > { %p745_p11 = por %p106_p10, %p74_p3  ;;  %s129_s26 = sand.u32 1, %s651_s13  }
  0x14   : > { %s420_s27 = sshll.u32 %s129_s26, 6  ;;  %s434_s28 = sshll.u32 %s659_s15, 10 }
  0x15   : > { %s876_s25 = scalar_select %p745_p11, 1, 0 }
  0x16   : > { %s756_s3 = scalar_lea.hbm %s870_s1, %s434_s28  ;;  %s133_s4 = scalar_lea.vmem [#allocation3], %s420_s27 }
  0x17   : > { %s143_s5 = sshll.u32 %s133_s4, 4  ;;  %p762_p0 = pnand %p449_p13, %p728_p4  ;;  %s758_s5 = int_to_ptr.vmem [resolvable:$true] %s143_s5 }
  0x18   : > { %s767_s7 = scalar_lea.sflag [#allocation4], %s129_s26  ;;  %s551_s8 = scalar_lea.hbm %s756_s3, 1024 }
  0x19   : > { %p552_p2 = scmp.ne.s32.totalorder %s756_s3, %s551_s8  ;;  %p553_p3 = pneg %p762_p0 }
  0x1a   : > { %s556_s0 = scalar_lea.hbm %s870_s1, 2048  ;;  %p557_p4 = scmp.lt.u32.totalorder %s756_s3, %s870_s1 }
  0x1b   : > { %p554_p5 = pnand %p553_p3, %p552_p2  ;;  %p558_p7 = scmp.lt.u32.totalorder %s556_s0, %s551_s8 }
  0x1c   : > { %p560_p13 = scmp.lt.u32.totalorder %s551_s8, %s756_s3 }
  0x1d   : > { %p555_p6 = pneg %p554_p5  ;;  %p559_p10 = por %p558_p7, %p557_p4 }
  0x1f   : > { %p561_p12 = por %p560_p13, %p559_p10 }
  0x21   : > { %p562_p1 = pnand %p561_p12, %p555_p6 }
  0x23   : > { %565 = shalt.err (!%p562_p1)
}
  0x24   : > { %s566_s20 = scalar_lea.vmem %s758_s5, 1024  ;;  %s665_s21 = smov [#allocation3]  }
  0x25   : > { %p567_p2 = scmp.ne.s32.totalorder %s758_s5, %s566_s20  ;;  %s571_s26 = sshll.u32 %s665_s21, 4  ;;  %s572_s26 = int_to_ptr.vmem [resolvable:$false] %s571_s26 }
  0x26   : > { %s573_s27 = scalar_lea.vmem %s572_s26, 2048  ;;  %p574_p9 = scmp.lt.s32.totalorder %s758_s5, %s572_s26 }
  0x27   : > { %p569_p5 = pnand %p567_p2, %p553_p3  ;;  %p575_p4 = scmp.lt.s32.totalorder %s573_s27, %s566_s20 }
  0x29   : > { %p570_p11 = pneg %p569_p5  ;;  %p576_p7 = por %p575_p4, %p574_p9 }
  0x2b   : > { %p577_p10 = pnand %p576_p7, %p570_p11 }
  0x2d   : > { %580 = shalt.err (!%p577_p10)
}
  0x2e   : > { %s666_s28 = smov 128   ;;  %s667_s29 = smov 8  }
  0x2f   : > { %444 = dma.hbm_to_vmem [thread:$0]  (!%p762_p0), %s756_s3, 1024, %s758_s5, %s767_s7, %s666_s28, %s666_s28, %s667_s29  }
  0x30   : > { %p151_p12 = scmp.lt.s32.totalorder %s663_s16, 3  ;;  %p878_p1 = scmp.ge.s32.totalorder %s663_s16, 1 }
  0x32   : > { %p152_p3 = pnand %p878_p1, %p151_p12 }
  0x33   : > { %s799_s30 = sand.u32 (!%p152_p3), 1, %s647_s12  }
  0x34   : > { %155 = sbr.rel (%p152_p3) target bundleno = 163 (0xa3), region = 28  ;;  %s424_s4 = sshll.u32 (!%p152_p3), %s799_s30, 6 }
  0x35   : > { %s158_s8 = scalar_lea.sflag (!%p152_p3), [#allocation4], %s799_s30  ;;  %s161_s9 = scalar_lea.vmem (!%p152_p3), [#allocation3], %s424_s4 }
  0x3b   : > { %634 = dma.done.wait (%p734_p8), %s158_s8, 1024  }
  0x3c   : > { %636 = vsyncadd (%p734_p8), %s158_s8, 4294966272  ;;  %s183_s6 = sld [smem:[#allocation2]]  ;;  %v187_v1 = vld [vmem:[%s161_s9] sm:$0xff]  ;;  %v188_v2 = vld [vmem:[%s161_s9 + $0x8] sm:$0xff]  ;;  %vm244_vm0 = vcmask 130048   ;;  %s425_s3 = sshll.u32 %s799_s30, 2 }
  0x3d   : > { %v189_v3 = vld [vmem:[%s161_s9 + $0x10] sm:$0xff]  ;;  %v190_v4 = vld [vmem:[%s161_s9 + $0x18] sm:$0xff]  ;;  %v191_v5 = vld [vmem:[%s161_s9 + $0x20] sm:$0xff]  ;;  %v195_v7 = vmax.f32 %v187_v1, 1e-06  ;;  %vm310_vm1 = vcmask 1041409  }
  0x3e   : > { %v192_v6 = vld [vmem:[%s161_s9 + $0x28] sm:$0xff]  ;;  %v193_v8 = vld [vmem:[%s161_s9 + $0x30] sm:$0xff]  ;;  %v196_v9 = vmax.f32 %v188_v2, 1e-06  ;;  %v197_v10 = vmax.f32 %v189_v3, 1e-06 }
  0x3f   : > { %v194_v11 = vld [vmem:[%s161_s9 + $0x38] sm:$0xff]  ;;  %v198_v12 = vmax.f32 %v190_v4, 1e-06  ;;  %v199_v13 = vmax.f32 %v191_v5, 1e-06  ;;  %vm312_vm2 = vcmask 1042434  }
  0x40   : > { %v200_v14 = vmax.f32 %v192_v6, 1e-06  ;;  %v201_v15 = vmax.f32 %v193_v8, 1e-06  ;;  %v202_v16 = vmax.f32 %v194_v11, 1e-06 }
  0x41   : > { %s431_s5 = sshll.u32 %s655_s14, 6  ;;  %s181_s7 = scalar_lea.vmem [#allocation6], %s425_s3  ;;  %vm314_vm3 = vcmask 1043459   ;;  %vm317_vm4 = vcmask 125952  }
  0x42   : > { %v184_v0 = vstv %s183_s6  ;;  %s334_s10 = sshll.u32 %s181_s7, 4  ;;  %s820_s19 = scalar_lea.hbm %s871_s2, %s431_s5  ;;  %s822_s10 = int_to_ptr.vmem [resolvable:$true] %s334_s10 }
  0x43   : > { %501 = vrcp.f32 %v184_v0  ;;  %s320_s14 = scalar_lea.sflag [#allocation5], %s799_s30  ;;  %s581_s20 = scalar_lea.vmem %s822_s10, 64 }
  0x44   : > { %503 = vlog2.f32 %v195_v7  ;;  %p582_p8 = scmp.ne.s32.totalorder %s822_s10, %s581_s20  ;;  %p879_p9 = scmp.ne.s32.totalorder %s875_s23, 0 }
  0x45   : > { %505 = vlog2.f32 %v196_v9  ;;  %s668_s21 = smov [#allocation6]  }
  0x46   : > { %507 = vlog2.f32 %v197_v10  ;;  %p583_p11 = pnand %p582_p8, %p879_p9  ;;  %s585_s26 = sshll.u32 %s668_s21, 4  ;;  %s586_s26 = int_to_ptr.vmem [resolvable:$false] %s585_s26 }
  0x47   : > { %509 = vlog2.f32 %v198_v12  ;;  %s587_s27 = scalar_lea.vmem %s586_s26, 128  ;;  %p588_p6 = scmp.lt.s32.totalorder %s822_s10, %s586_s26 }
  0x48   : > { %511 = vlog2.f32 %v199_v13  ;;  %p584_p0 = pneg %p583_p11  ;;  %p589_p13 = scmp.lt.s32.totalorder %s587_s27, %s581_s20 }
  0x49   : > { %513 = vlog2.f32 %v200_v14 }
  0x4a   : > { %515 = vlog2.f32 %v201_v15  ;;  %p590_p2 = por %p589_p13, %p588_p6 }
  0x4b   : > { %517 = vlog2.f32 %v202_v16 }
  0x4c   : > { %p591_p5 = pnand %p590_p2, %p584_p0 }
  0x4d   : > { %v502_v17 = vpop.eup %501 }
  0x4e   : > { %435 = vpush %v502_v17  ;;  %v504_v18 = vpop.eup %503 }
  0x4f   : > { %v506_v19 = vpop.eup %505  ;;  %v204_v20 = vmul.f32 0.6931472, %v504_v18 }
  0x50   : > { %v508_v21 = vpop.eup %507  ;;  %v206_v22 = vmul.f32 0.6931472, %v506_v19 }
  0x51   : > { %v510_v23 = vpop.eup %509  ;;  %v208_v24 = vmul.f32 0.6931472, %v508_v21  ;;  %v220_v25 = vmul.f32 %v204_v20, %v184_v0 }
  0x52   : > { %v512_v26 = vpop.eup %511  ;;  %v210_v27 = vmul.f32 0.6931472, %v510_v23  ;;  %v221_v28 = vmul.f32 %v206_v22, %v184_v0 }
  0x53   : > { %v514_v29 = vpop.eup %513  ;;  %v212_v30 = vmul.f32 0.6931472, %v512_v26  ;;  %v222_v31 = vmul.f32 %v208_v24, %v184_v0  ;;  %v228_v32 = vmul.f32 1.442695, %v220_v25 }
  0x54   : > { %v516_v33 = vpop.eup %515  ;;  %v214_v34 = vmul.f32 0.6931472, %v514_v29  ;;  %v223_v35 = vmul.f32 %v210_v27, %v184_v0  ;;  %v230_v36 = vmul.f32 1.442695, %v221_v28 }
  0x55   : > { %v518_v37 = vpop.eup %517  ;;  %v216_v38 = vmul.f32 0.6931472, %v516_v33  ;;  %v224_v39 = vmul.f32 %v212_v30, %v184_v0  ;;  %519 = vpow2.f32 %v228_v32  ;;  %v232_v40 = vmul.f32 1.442695, %v222_v31 }
  0x56   : > { %v218_v41 = vmul.f32 0.6931472, %v518_v37  ;;  %v225_v42 = vmul.f32 %v214_v34, %v184_v0  ;;  %521 = vpow2.f32 %v230_v36  ;;  %v234_v43 = vmul.f32 1.442695, %v223_v35 }
  0x57   : > { %v226_v44 = vmul.f32 %v216_v38, %v184_v0  ;;  %523 = vpow2.f32 %v232_v40  ;;  %v236_v45 = vmul.f32 1.442695, %v224_v39 }
  0x58   : > { %v227_v46 = vmul.f32 %v218_v41, %v184_v0  ;;  %525 = vpow2.f32 %v234_v43  ;;  %v238_v47 = vmul.f32 1.442695, %v225_v42 }
  0x59   : > { %527 = vpow2.f32 %v236_v45  ;;  %v240_v48 = vmul.f32 1.442695, %v226_v44 }
  0x5a   : > { %529 = vpow2.f32 %v238_v47  ;;  %v242_v49 = vmul.f32 1.442695, %v227_v46 }
  0x5b   : > { %531 = vpow2.f32 %v240_v48 }
  0x5c   : > { %533 = vpow2.f32 %v242_v49 }
  0x5f   : > { %v520_v50 = vpop.eup %519 }
  0x60   : > { %v522_v51 = vpop.eup %521  ;;  %v245_v52 = vsel %vm244_vm0, %v520_v50, 0.0 }
  0x61   : > { %v524_v53 = vpop.eup %523  ;;  %v246_v54 = vsel %vm244_vm0, %v522_v51, 0.0 }
  0x62   : > { %v526_v55 = vpop.eup %525  ;;  %v247_v56 = vadd.f32 %v246_v54, %v245_v52  ;;  %v254_v57 = vsel %vm244_vm0, %v524_v53, 0.0 }
  0x63   : > { %v528_v58 = vpop.eup %527  ;;  %v255_v59 = vsel %vm244_vm0, %v526_v55, 0.0 }
  0x64   : > { %v530_v60 = vpop.eup %529  ;;  %v248_v61 = vrot.slane %v247_v56, 4  ;;  %v256_v62 = vadd.f32 %v255_v59, %v254_v57  ;;  %v263_v63 = vsel %vm244_vm0, %v528_v58, 0.0 }
  0x65   : > { %v532_v0 = vpop.eup %531  ;;  %v264_v1 = vsel %vm244_vm0, %v530_v60, 0.0 }
  0x66   : > { %v534_v2 = vpop.eup %533  ;;  %v249_v3 = vadd.f32 %v248_v61, %v247_v56  ;;  %v257_v4 = vrot.slane %v256_v62, 4  ;;  %v265_v5 = vadd.f32 %v264_v1, %v263_v63  ;;  %v272_v6 = vsel %vm244_vm0, %v532_v0, 0.0 }
  0x67   : > { %v273_v7 = vsel %vm244_vm0, %v534_v2, 0.0 }
  0x68   : > { %v250_v8 = vrot.slane %v249_v3, 2  ;;  %v258_v9 = vadd.f32 %v257_v4, %v256_v62  ;;  %v266_v10 = vrot.slane %v265_v5, 4  ;;  %v274_v11 = vadd.f32 %v273_v7, %v272_v6 }
  0x6a   : > { %v251_v12 = vadd.f32 %v250_v8, %v249_v3  ;;  %v259_v13 = vrot.slane %v258_v9, 2  ;;  %v267_v14 = vadd.f32 %v266_v10, %v265_v5  ;;  %v275_v15 = vrot.slane %v274_v11, 4 }
  0x6c   : > { %v252_v16 = vrot.slane %v251_v12, 1  ;;  %v260_v17 = vadd.f32 %v259_v13, %v258_v9  ;;  %v268_v18 = vrot.slane %v267_v14, 2  ;;  %v276_v19 = vadd.f32 %v275_v15, %v274_v11 }
  0x6e   : > { %v253_v20 = vadd.f32 %v252_v16, %v251_v12  ;;  %v261_v21 = vrot.slane %v260_v17, 1  ;;  %v269_v22 = vadd.f32 %v268_v18, %v267_v14  ;;  %v277_v23 = vrot.slane %v276_v19, 2 }
  0x70   : > { %v262_v24 = vadd.f32 %v261_v21, %v260_v17  ;;  %v270_v25 = vrot.slane %v269_v22, 1  ;;  %v278_v26 = vadd.f32 %v277_v23, %v276_v19  ;;  %535 = vlog2.f32 %v253_v20 }
  0x72   : > { %v271_v27 = vadd.f32 %v270_v25, %v269_v22  ;;  %v279_v28 = vrot.slane %v278_v26, 1  ;;  %537 = vlog2.f32 %v262_v24 }
  0x74   : > { %v280_v29 = vadd.f32 %v279_v28, %v278_v26  ;;  %539 = vlog2.f32 %v271_v27 }
  0x76   : > { %541 = vlog2.f32 %v280_v29 }
  0x7a   : > { %v536_v30 = vpop.eup %535 }
  0x7b   : > { %v282_v31 = vmul.f32 0.6931472, %v536_v30 }
  0x7c   : > { %v538_v32 = vpop.eup %537 }
  0x7d   : > { %v284_v33 = vmul.f32 0.6931472, %v538_v32  ;;  %v426_v34 = vadd.f32 -2.7725887, %v282_v31 }
  0x7e   : > { %v540_v35 = vpop.eup %539 }
  0x7f   : > { %s436_s22 = spop %435  ;;  %v286_v36 = vmul.f32 0.6931472, %v540_v35  ;;  %v427_v37 = vadd.f32 -2.7725887, %v284_v33 }
  0x80   : > { %v293_v38 = vstv %s436_s22  ;;  %v542_v39 = vpop.eup %541 }
  0x81   : > { %v294_v40 = vmul.f32 %v426_v34, %v293_v38  ;;  %v288_v41 = vmul.f32 0.6931472, %v542_v39  ;;  %v428_v42 = vadd.f32 -2.7725887, %v286_v36  ;;  %v295_v43 = vmul.f32 %v427_v37, %v293_v38 }
  0x83   : > { %v298_v44 = vmul.f32 1.442695, %v294_v40  ;;  %v429_v45 = vadd.f32 -2.7725887, %v288_v41  ;;  %v296_v46 = vmul.f32 %v428_v42, %v293_v38  ;;  %v300_v47 = vmul.f32 1.442695, %v295_v43 }
  0x85   : > { %543 = vpow2.f32 %v298_v44  ;;  %v297_v48 = vmul.f32 %v429_v45, %v293_v38  ;;  %v302_v49 = vmul.f32 1.442695, %v296_v46 }
  0x86   : > { %545 = vpow2.f32 %v300_v47 }
  0x87   : > { %547 = vpow2.f32 %v302_v49  ;;  %v304_v50 = vmul.f32 1.442695, %v297_v48 }
  0x89   : > { %549 = vpow2.f32 %v304_v50 }
  0x8f   : > { %v544_v51 = vpop.eup %543 }
  0x90   : > { %v546_v52 = vpop.eup %545 }
  0x91   : > { %v311_v53 = vsel %vm310_vm1, %v546_v52, %v544_v51  ;;  %v548_v54 = vpop.eup %547 }
  0x92   : > { %v313_v55 = vsel %vm312_vm2, %v548_v54, %v311_v53 }
  0x93   : > { %v550_v56 = vpop.eup %549 }
  0x94   : > { %v315_v57 = vsel %vm314_vm3, %v550_v56, %v313_v55 }
  0x95   : > { %318 = vst.msk [vmem:[%s181_s7] sm:$0xf] %vm317_vm4, %v315_v57 }
  0x96   : > { %594 = shalt.err (!%p591_p5)
}
  0x97   : > { %s595_s28 = scalar_lea.hbm %s820_s19, 64  ;;  %s599_s4 = scalar_lea.hbm %s871_s2, 128 }
  0x98   : > { %p596_p4 = scmp.ne.s32.totalorder %s820_s19, %s595_s28  ;;  %p600_p12 = scmp.lt.u32.totalorder %s820_s19, %s871_s2 }
  0x99   : > { %p601_p1 = scmp.lt.u32.totalorder %s599_s4, %s595_s28  ;;  %p603_p8 = scmp.lt.u32.totalorder %s595_s28, %s820_s19 }
  0x9a   : > { %p597_p7 = pnand %p596_p4, %p879_p9 }
  0x9b   : > { %p602_p3 = por %p601_p1, %p600_p12 }
  0x9c   : > { %p598_p10 = pneg %p597_p7 }
  0x9d   : > { %p604_p11 = por %p603_p8, %p602_p3 }
  0x9f   : > { %p605_p0 = pnand %p604_p11, %p598_p10 }
  0xa1   : > { %608 = shalt.err (!%p605_p0)
}
  0xa2   : > { %439 = dma.vmem_to_hbm [thread:$0]  (%p879_p9), %s822_s10, 64, %s820_s19, %s320_s14  }
  0xa3 PF: > { %s346_s6 = sand.u32 1, %s643_s11   ;;  %p880_p6 = scmp.ne.s32.totalorder %s876_s25, 0 }
  0xa4   : > { %p881_p13 = scmp.ge.s32.totalorder %s663_s16, 2  ;;  %s347_s22 = scalar_lea.sflag [#allocation5], %s346_s6 }
  0xa6   : > { %p446_p2 = pnand %p881_p13, %p880_p6 }
  0xa8   : > { %638 = dma.done.wait (!%p446_p2), %s347_s22, 64  }
  0xa9   : > { %640 = vsyncadd (!%p446_p2), %s347_s22, 4294967232  ;;  %s19_s16 = sadd.s32 1, %s663_s16   ;;  %s882_s11 = smov %s647_s12 }
  0xaa   : > { %p16_p5 = scmp.ge.s32.totalorder %s19_s16, 4   ;;  %s883_s12 = smov %s651_s13 }
  0xab   : > { %s884_s13 = smov %s743_s24  ;;  %s885_s14 = smov %s659_s15 }
  0xac   : > { %s886_s15 = smov %s888_s18  ;;  %18 = sbr.rel (!%p16_p5) target bundleno = 8 (0x8), region = 73 }
  0xb3   :  { %352 = vsyncpa [#allocation4], 1 }
  0xb4   :  { %354 = vsyncpa [#allocation4 + $0x1], 1 }
  0xb5   :  { %355 = vsyncpa [#allocation5], 1 }
  0xb6   :  { %357 = vsyncpa [#allocation5 + $0x1], 1 }

</bundles_post_ra>
